<compile_context>
chip_gen: v5e
topology: v5e:2x2
jax: 0.10.0
libtpu: 0.0.40
codegen_flags: <defaults>
</compile_context>

<pallas_src>
import math
import functools

import jax
import jax.numpy as jnp
from jax import lax
from jax.experimental import pallas as pl
from jax.experimental.pallas import tpu as pltpu


def _mha_kernel(q_ref, h_ref, wq_ref, wkv_ref, wo_ref, o_ref,
                *, n_heads, key_dim, val_dim, norm_factor):
    # q_ref  : (Bb, Nq, D)               batch block
    # h_ref  : (Bb, Ng, D)               batch block
    # wq_ref : (D, H*Kd)                 packed W_query (all heads)
    # wkv_ref: (D, H*Kd + H*Vd)          packed [W_key | W_val] (all heads)
    # wo_ref : (H*Vd, E)                 packed W_out (PyTorch .view(-1, E) layout)
    # o_ref  : (Bb, Nq, E)               output batch block
    Bb, Nq, D = q_ref.shape
    _, Ng, _ = h_ref.shape
    HKd = n_heads * key_dim

    # Fold batch into matmul rows: leading-dim collapse keeps the lane layout.
    qf = q_ref[...].reshape(Bb * Nq, D)       # native dtype straight to the MXU
    hf = h_ref[...].reshape(Bb * Ng, D)

    # Packed projections: one MXU matmul for Q, one fused matmul for K and V.
    Q = jnp.dot(qf, wq_ref[...], preferred_element_type=jnp.float32)    # (Bb*Nq, H*Kd)
    KV = jnp.dot(hf, wkv_ref[...], preferred_element_type=jnp.float32)  # (Bb*Ng, H*Kd+H*Vd)
    K = KV[:, :HKd]                                                     # (Bb*Ng, H*Kd)
    V = KV[:, HKd:]                                                     # (Bb*Ng, H*Vd)

    # Per-(batch, head) scaled-dot-product attention, statically unrolled
    # (Bb and H are small).  Head outputs stay in registers; no VMEM staging.
    heads_rows = []
    for b in range(Bb):
        q_b = Q[b * Nq:(b + 1) * Nq]          # (Nq, H*Kd)
        k_b = K[b * Ng:(b + 1) * Ng]          # (Ng, H*Kd)
        v_b = V[b * Ng:(b + 1) * Ng]          # (Ng, H*Vd)
        head_cols = []
        for i in range(n_heads):
            q_i = q_b[:, i * key_dim:(i + 1) * key_dim]    # (Nq, Kd)
            k_i = k_b[:, i * key_dim:(i + 1) * key_dim]    # (Ng, Kd)
            v_i = v_b[:, i * val_dim:(i + 1) * val_dim]    # (Ng, Vd)

            # Contract last dims directly — no explicit K transpose.
            s = norm_factor * lax.dot_general(
                q_i, k_i, (((1,), (1,)), ((), ())),
                preferred_element_type=jnp.float32)        # (Nq, Ng)

            m = jnp.max(s, axis=-1, keepdims=True)
            e = jnp.exp(s - m)
            inv_l = pl.reciprocal(jnp.sum(e, axis=-1, keepdims=True), approx=True)
            attn = e * inv_l
            head_cols.append(jnp.dot(attn, v_i,
                                     preferred_element_type=jnp.float32))  # (Nq, Vd)
        heads_rows.append(jnp.concatenate(head_cols, axis=-1))             # (Nq, H*Vd)

    heads = jnp.concatenate(heads_rows, axis=0)                            # (Bb*Nq, H*Vd)

    # Single packed output projection over all heads and all batch rows.
    out = jnp.dot(heads, wo_ref[...], preferred_element_type=jnp.float32)  # (Bb*Nq, E)
    o_ref[...] = out.reshape(Bb, Nq, -1).astype(o_ref.dtype)


def _default_batch_block(B):
    """Single-TC chips (v5e/v6e): collapse the grid (Bb = B).
    Dual-TC v7x: keep >= 2 parallel grid blocks so both TensorCores run."""
    try:
        kind = jax.devices()[0].device_kind.lower()
    except Exception:
        kind = ""
    if "v7" in kind and B >= 2 and B % 2 == 0:
        return B // 2
    return B


def multi_head_attention(q, h=None, *, w_query, w_key, w_val, w_out,
                         mask=None, batch_block=None):
    """q:(B,Nq,D)  h:(B,Ng,D)  w_query/w_key:(H,D,Kd)  w_val:(H,D,Vd)  w_out:(H,Vd,E)"""
    if mask is not None:
        raise NotImplementedError("mask is not supported by this Pallas kernel")
    if h is None:
        h = q

    B, Nq, D = q.shape
    _, Ng, _ = h.shape
    H, _, Kd = w_query.shape
    Vd = w_val.shape[-1]
    E = w_out.shape[-1]
    norm_factor = 1.0 / math.sqrt(Kd)

    Bb = _default_batch_block(B) if batch_block is None else batch_block
    assert B % Bb == 0, "batch_block must divide batch size"
    grid_b = B // Bb

    # Pack per-head weights into lane-dense 2-D matmul operands (one-time
    # layout plumbing in the wrapper, outside the kernel).  K and V are fused
    # into a single operand so the `h` projection is one wider MXU matmul.
    wq_p = jnp.transpose(w_query, (1, 0, 2)).reshape(D, H * Kd)
    wk_p = jnp.transpose(w_key, (1, 0, 2)).reshape(D, H * Kd)
    wv_p = jnp.transpose(w_val, (1, 0, 2)).reshape(D, H * Vd)
    wkv_p = jnp.concatenate([wk_p, wv_p], axis=-1)            # (D, H*Kd + H*Vd)
    wo_p = w_out.reshape(H * Vd, E)                           # == W_out.view(-1, embed_dim)

    kernel = functools.partial(_mha_kernel, n_heads=H, key_dim=Kd, val_dim=Vd,
                               norm_factor=norm_factor)

    return pl.pallas_call(
        kernel,
        out_shape=jax.ShapeDtypeStruct((B, Nq, E), q.dtype),
        grid_spec=pltpu.PrefetchScalarGridSpec(
            num_scalar_prefetch=0,
            grid=(grid_b,),
            in_specs=[
                pl.BlockSpec((Bb, Nq, D), lambda b: (b, 0, 0)),          # q block
                pl.BlockSpec((Bb, Ng, D), lambda b: (b, 0, 0)),          # h block
                pl.BlockSpec((D, H * Kd), lambda b: (0, 0)),             # W_query packed
                pl.BlockSpec((D, H * Kd + H * Vd), lambda b: (0, 0)),    # [W_key|W_val] packed
                pl.BlockSpec((H * Vd, E), lambda b: (0, 0)),             # W_out packed
            ],
            out_specs=pl.BlockSpec((Bb, Nq, E), lambda b: (b, 0, 0)),
        ),
        compiler_params=pltpu.CompilerParams(
            dimension_semantics=("parallel",)),
    )(q, h, wq_p, wkv_p, wo_p)


def _reference(q, h, w_query, w_key, w_val, w_out):
    """Pure-JAX reference mirroring the PyTorch forward (mask=None)."""
    H, D, Kd = w_query.shape
    norm = 1.0 / math.sqrt(Kd)
    Q = jnp.einsum('bqd,hdk->hbqk', q, w_query)
    K = jnp.einsum('bgd,hdk->hbgk', h, w_key)
    V = jnp.einsum('bgd,hdv->hbgv', h, w_val)
    compat = norm * jnp.einsum('hbqk,hbgk->hbqg', Q, K)
    attn = jax.nn.softmax(compat, axis=-1)
    heads = jnp.einsum('hbqg,hbgv->hbqv', attn, V)
    out = jnp.einsum('hbqv,hve->bqe', heads, w_out)
    return out


if __name__ == "__main__":
    # Module config
    n_heads = 4
    input_dim = 32
    embed_dim = 32
    key_dim = embed_dim // n_heads   # 8
    val_dim = embed_dim // n_heads   # 8

    # Data shapes
    batch_size = 2
    n_query = 8
    graph_size = 8

    key = jax.random.PRNGKey(0)
    k_q, k_h, k_wq, k_wk, k_wv, k_wo = jax.random.split(key, 6)

    q = jax.random.normal(k_q, (batch_size, n_query, input_dim), jnp.float32)
    h = jax.random.normal(k_h, (batch_size, graph_size, input_dim), jnp.float32)

    # Deterministic parameter init matching nn.Module: uniform(-1/sqrt(last_dim), +)
    def init_param(k, shape):
        stdv = 1.0 / math.sqrt(shape[-1])
        return jax.random.uniform(k, shape, jnp.float32, -stdv, stdv)

    W_query = init_param(k_wq, (n_heads, input_dim, key_dim))
    W_key   = init_param(k_wk, (n_heads, input_dim, key_dim))
    W_val   = init_param(k_wv, (n_heads, input_dim, val_dim))
    W_out   = init_param(k_wo, (n_heads, val_dim, embed_dim))

    out = multi_head_attention(q, h, w_query=W_query, w_key=W_key,
                               w_val=W_val, w_out=W_out)
    out = jax.block_until_ready(out)

    ref = _reference(q, h, W_query, W_key, W_val, W_out)
    assert out.shape == (batch_size, n_query, embed_dim)
    # Tolerance loosened slightly vs f64 exactness because the softmax
    # denominator uses the EUP approximate reciprocal.
    assert jnp.allclose(out, ref, atol=2e-3, rtol=2e-3), "mismatch vs reference"

    print("KERNEL_OK")
</pallas_src>

<mosaic_0001>
module attributes {stable_mosaic.version = 11 : i64} {
  func.func @_mha_kernel(%arg0: i32, %arg1: memref<2x8x32xf32, #tpu.memory_space<vmem>>, %arg2: memref<2x8x32xf32, #tpu.memory_space<vmem>>, %arg3: memref<32x32xf32, #tpu.memory_space<vmem>>, %arg4: memref<32x64xf32, #tpu.memory_space<vmem>>, %arg5: memref<32x32xf32, #tpu.memory_space<vmem>>, %arg6: memref<2x8x32xf32, #tpu.memory_space<vmem>>) attributes {dimension_semantics = [#tpu.dimension_semantics<parallel>], iteration_bounds = array<i64: 1>, scalar_prefetch = 0 : i64, scratch_operands = 0 : i64, tpu.core_type = #tpu.core_type<tc>, window_params = [{transform_indices = @transform_0, window_bounds = array<i64: 2, 8, 32>}, {transform_indices = @transform_1, window_bounds = array<i64: 2, 8, 32>}, {pipeline_mode = #tpu.pipeline_mode<synchronous>, transform_indices = @transform_2, window_bounds = array<i64: 32, 32>}, {pipeline_mode = #tpu.pipeline_mode<synchronous>, transform_indices = @transform_3, window_bounds = array<i64: 32, 64>}, {pipeline_mode = #tpu.pipeline_mode<synchronous>, transform_indices = @transform_4, window_bounds = array<i64: 32, 32>}, {transform_indices = @transform_5, window_bounds = array<i64: 2, 8, 32>}]} {
    %c0 = arith.constant 0 : index
    %c0_0 = arith.constant 0 : index
    %c0_1 = arith.constant 0 : index
    %0 = vector.load %arg1[%c0, %c0_0, %c0_1] : memref<2x8x32xf32, #tpu.memory_space<vmem>>, vector<2x8x32xf32>
    %1 = vector.shape_cast %0 : vector<2x8x32xf32> to vector<16x32xf32>
    %c0_2 = arith.constant 0 : index
    %c0_3 = arith.constant 0 : index
    %c0_4 = arith.constant 0 : index
    %2 = vector.load %arg2[%c0_2, %c0_3, %c0_4] : memref<2x8x32xf32, #tpu.memory_space<vmem>>, vector<2x8x32xf32>
    %3 = vector.shape_cast %2 : vector<2x8x32xf32> to vector<16x32xf32>
    %c0_5 = arith.constant 0 : index
    %c0_6 = arith.constant 0 : index
    %4 = vector.load %arg3[%c0_5, %c0_6] : memref<32x32xf32, #tpu.memory_space<vmem>>, vector<32x32xf32>
    %cst = arith.constant dense<0.000000e+00> : vector<16x32xf32>
    %5 = tpu.matmul %1, %4, %cst {dimension_numbers = #tpu.dot_dimension_numbers<[1], [0], [0], [1], [0, 0, 1, 1], [], []>} : vector<16x32xf32>, vector<32x32xf32>, vector<16x32xf32> -> vector<16x32xf32>
    %c0_7 = arith.constant 0 : index
    %c0_8 = arith.constant 0 : index
    %6 = vector.load %arg4[%c0_7, %c0_8] : memref<32x64xf32, #tpu.memory_space<vmem>>, vector<32x64xf32>
    %cst_9 = arith.constant dense<0.000000e+00> : vector<16x64xf32>
    %7 = tpu.matmul %3, %6, %cst_9 {dimension_numbers = #tpu.dot_dimension_numbers<[1], [0], [0], [1], [0, 0, 1, 1], [], []>} : vector<16x32xf32>, vector<32x64xf32>, vector<16x64xf32> -> vector<16x64xf32>
    %8 = vector.extract_strided_slice %7 {offsets = [0, 0], sizes = [16, 32], strides = [1, 1]} : vector<16x64xf32> to vector<16x32xf32>
    %9 = vector.extract_strided_slice %7 {offsets = [0, 32], sizes = [16, 32], strides = [1, 1]} : vector<16x64xf32> to vector<16x32xf32>
    %10 = vector.extract_strided_slice %5 {offsets = [0, 0], sizes = [8, 32], strides = [1, 1]} : vector<16x32xf32> to vector<8x32xf32>
    %11 = vector.extract_strided_slice %8 {offsets = [0, 0], sizes = [8, 32], strides = [1, 1]} : vector<16x32xf32> to vector<8x32xf32>
    %12 = vector.extract_strided_slice %9 {offsets = [0, 0], sizes = [8, 32], strides = [1, 1]} : vector<16x32xf32> to vector<8x32xf32>
    %13 = vector.extract_strided_slice %10 {offsets = [0, 0], sizes = [8, 8], strides = [1, 1]} : vector<8x32xf32> to vector<8x8xf32>
    %14 = vector.extract_strided_slice %11 {offsets = [0, 0], sizes = [8, 8], strides = [1, 1]} : vector<8x32xf32> to vector<8x8xf32>
    %15 = vector.extract_strided_slice %12 {offsets = [0, 0], sizes = [8, 8], strides = [1, 1]} : vector<8x32xf32> to vector<8x8xf32>
    %cst_10 = arith.constant dense<0.000000e+00> : vector<8x8xf32>
    %16 = tpu.matmul %13, %14, %cst_10 {dimension_numbers = #tpu.dot_dimension_numbers<[1], [1], [0], [0], [0, 0, 1, 0], [], []>} : vector<8x8xf32>, vector<8x8xf32>, vector<8x8xf32> -> vector<8x8xf32>
    %cst_11 = arith.constant 0.353553385 : f32
    %17 = vector.broadcast %cst_11 : f32 to vector<8x8xf32>
    %18 = arith.mulf %17, %16 : vector<8x8xf32>
    %cst_12 = arith.constant dense<0xFF800000> : vector<8xf32>
    %19 = vector.multi_reduction <maximumf>, %18, %cst_12 [1] : vector<8x8xf32> to vector<8xf32>
    %20 = vector.shape_cast %19 : vector<8xf32> to vector<8x1xf32>
    %21 = vector.broadcast %20 : vector<8x1xf32> to vector<8x8xf32>
    %22 = arith.subf %18, %21 : vector<8x8xf32>
    %23 = math.exp %22 : vector<8x8xf32>
    %cst_13 = arith.constant dense<0.000000e+00> : vector<8xf32>
    %24 = vector.multi_reduction <add>, %23, %cst_13 [1] : vector<8x8xf32> to vector<8xf32>
    %25 = vector.shape_cast %24 : vector<8xf32> to vector<8x1xf32>
    %26 = tpu.reciprocal %25 {approx = true} : vector<8x1xf32> -> vector<8x1xf32>
    %27 = vector.broadcast %26 : vector<8x1xf32> to vector<8x8xf32>
    %28 = arith.mulf %23, %27 : vector<8x8xf32>
    %cst_14 = arith.constant dense<0.000000e+00> : vector<8x8xf32>
    %29 = tpu.matmul %28, %15, %cst_14 {dimension_numbers = #tpu.dot_dimension_numbers<[1], [0], [0], [1], [0, 0, 1, 1], [], []>} : vector<8x8xf32>, vector<8x8xf32>, vector<8x8xf32> -> vector<8x8xf32>
    %30 = vector.extract_strided_slice %10 {offsets = [0, 8], sizes = [8, 8], strides = [1, 1]} : vector<8x32xf32> to vector<8x8xf32>
    %31 = vector.extract_strided_slice %11 {offsets = [0, 8], sizes = [8, 8], strides = [1, 1]} : vector<8x32xf32> to vector<8x8xf32>
    %32 = vector.extract_strided_slice %12 {offsets = [0, 8], sizes = [8, 8], strides = [1, 1]} : vector<8x32xf32> to vector<8x8xf32>
    %cst_15 = arith.constant dense<0.000000e+00> : vector<8x8xf32>
    %33 = tpu.matmul %30, %31, %cst_15 {dimension_numbers = #tpu.dot_dimension_numbers<[1], [1], [0], [0], [0, 0, 1, 0], [], []>} : vector<8x8xf32>, vector<8x8xf32>, vector<8x8xf32> -> vector<8x8xf32>
    %cst_16 = arith.constant 0.353553385 : f32
    %34 = vector.broadcast %cst_16 : f32 to vector<8x8xf32>
    %35 = arith.mulf %34, %33 : vector<8x8xf32>
    %cst_17 = arith.constant dense<0xFF800000> : vector<8xf32>
    %36 = vector.multi_reduction <maximumf>, %35, %cst_17 [1] : vector<8x8xf32> to vector<8xf32>
    %37 = vector.shape_cast %36 : vector<8xf32> to vector<8x1xf32>
    %38 = vector.broadcast %37 : vector<8x1xf32> to vector<8x8xf32>
    %39 = arith.subf %35, %38 : vector<8x8xf32>
    %40 = math.exp %39 : vector<8x8xf32>
    %cst_18 = arith.constant dense<0.000000e+00> : vector<8xf32>
    %41 = vector.multi_reduction <add>, %40, %cst_18 [1] : vector<8x8xf32> to vector<8xf32>
    %42 = vector.shape_cast %41 : vector<8xf32> to vector<8x1xf32>
    %43 = tpu.reciprocal %42 {approx = true} : vector<8x1xf32> -> vector<8x1xf32>
    %44 = vector.broadcast %43 : vector<8x1xf32> to vector<8x8xf32>
    %45 = arith.mulf %40, %44 : vector<8x8xf32>
    %cst_19 = arith.constant dense<0.000000e+00> : vector<8x8xf32>
    %46 = tpu.matmul %45, %32, %cst_19 {dimension_numbers = #tpu.dot_dimension_numbers<[1], [0], [0], [1], [0, 0, 1, 1], [], []>} : vector<8x8xf32>, vector<8x8xf32>, vector<8x8xf32> -> vector<8x8xf32>
    %47 = vector.extract_strided_slice %10 {offsets = [0, 16], sizes = [8, 8], strides = [1, 1]} : vector<8x32xf32> to vector<8x8xf32>
    %48 = vector.extract_strided_slice %11 {offsets = [0, 16], sizes = [8, 8], strides = [1, 1]} : vector<8x32xf32> to vector<8x8xf32>
    %49 = vector.extract_strided_slice %12 {offsets = [0, 16], sizes = [8, 8], strides = [1, 1]} : vector<8x32xf32> to vector<8x8xf32>
    %cst_20 = arith.constant dense<0.000000e+00> : vector<8x8xf32>
    %50 = tpu.matmul %47, %48, %cst_20 {dimension_numbers = #tpu.dot_dimension_numbers<[1], [1], [0], [0], [0, 0, 1, 0], [], []>} : vector<8x8xf32>, vector<8x8xf32>, vector<8x8xf32> -> vector<8x8xf32>
    %cst_21 = arith.constant 0.353553385 : f32
    %51 = vector.broadcast %cst_21 : f32 to vector<8x8xf32>
    %52 = arith.mulf %51, %50 : vector<8x8xf32>
    %cst_22 = arith.constant dense<0xFF800000> : vector<8xf32>
    %53 = vector.multi_reduction <maximumf>, %52, %cst_22 [1] : vector<8x8xf32> to vector<8xf32>
    %54 = vector.shape_cast %53 : vector<8xf32> to vector<8x1xf32>
    %55 = vector.broadcast %54 : vector<8x1xf32> to vector<8x8xf32>
    %56 = arith.subf %52, %55 : vector<8x8xf32>
    %57 = math.exp %56 : vector<8x8xf32>
    %cst_23 = arith.constant dense<0.000000e+00> : vector<8xf32>
    %58 = vector.multi_reduction <add>, %57, %cst_23 [1] : vector<8x8xf32> to vector<8xf32>
    %59 = vector.shape_cast %58 : vector<8xf32> to vector<8x1xf32>
    %60 = tpu.reciprocal %59 {approx = true} : vector<8x1xf32> -> vector<8x1xf32>
    %61 = vector.broadcast %60 : vector<8x1xf32> to vector<8x8xf32>
    %62 = arith.mulf %57, %61 : vector<8x8xf32>
    %cst_24 = arith.constant dense<0.000000e+00> : vector<8x8xf32>
    %63 = tpu.matmul %62, %49, %cst_24 {dimension_numbers = #tpu.dot_dimension_numbers<[1], [0], [0], [1], [0, 0, 1, 1], [], []>} : vector<8x8xf32>, vector<8x8xf32>, vector<8x8xf32> -> vector<8x8xf32>
    %64 = vector.extract_strided_slice %10 {offsets = [0, 24], sizes = [8, 8], strides = [1, 1]} : vector<8x32xf32> to vector<8x8xf32>
    %65 = vector.extract_strided_slice %11 {offsets = [0, 24], sizes = [8, 8], strides = [1, 1]} : vector<8x32xf32> to vector<8x8xf32>
    %66 = vector.extract_strided_slice %12 {offsets = [0, 24], sizes = [8, 8], strides = [1, 1]} : vector<8x32xf32> to vector<8x8xf32>
    %cst_25 = arith.constant dense<0.000000e+00> : vector<8x8xf32>
    %67 = tpu.matmul %64, %65, %cst_25 {dimension_numbers = #tpu.dot_dimension_numbers<[1], [1], [0], [0], [0, 0, 1, 0], [], []>} : vector<8x8xf32>, vector<8x8xf32>, vector<8x8xf32> -> vector<8x8xf32>
    %cst_26 = arith.constant 0.353553385 : f32
    %68 = vector.broadcast %cst_26 : f32 to vector<8x8xf32>
    %69 = arith.mulf %68, %67 : vector<8x8xf32>
    %cst_27 = arith.constant dense<0xFF800000> : vector<8xf32>
    %70 = vector.multi_reduction <maximumf>, %69, %cst_27 [1] : vector<8x8xf32> to vector<8xf32>
    %71 = vector.shape_cast %70 : vector<8xf32> to vector<8x1xf32>
    %72 = vector.broadcast %71 : vector<8x1xf32> to vector<8x8xf32>
    %73 = arith.subf %69, %72 : vector<8x8xf32>
    %74 = math.exp %73 : vector<8x8xf32>
    %cst_28 = arith.constant dense<0.000000e+00> : vector<8xf32>
    %75 = vector.multi_reduction <add>, %74, %cst_28 [1] : vector<8x8xf32> to vector<8xf32>
    %76 = vector.shape_cast %75 : vector<8xf32> to vector<8x1xf32>
    %77 = tpu.reciprocal %76 {approx = true} : vector<8x1xf32> -> vector<8x1xf32>
    %78 = vector.broadcast %77 : vector<8x1xf32> to vector<8x8xf32>
    %79 = arith.mulf %74, %78 : vector<8x8xf32>
    %cst_29 = arith.constant dense<0.000000e+00> : vector<8x8xf32>
    %80 = tpu.matmul %79, %66, %cst_29 {dimension_numbers = #tpu.dot_dimension_numbers<[1], [0], [0], [1], [0, 0, 1, 1], [], []>} : vector<8x8xf32>, vector<8x8xf32>, vector<8x8xf32> -> vector<8x8xf32>
    %81 = tpu.concatenate %29, %46, %63, %80 in 1 : vector<8x8xf32>, vector<8x8xf32>, vector<8x8xf32>, vector<8x8xf32> -> vector<8x32xf32>
    %82 = vector.extract_strided_slice %5 {offsets = [8, 0], sizes = [8, 32], strides = [1, 1]} : vector<16x32xf32> to vector<8x32xf32>
    %83 = vector.extract_strided_slice %8 {offsets = [8, 0], sizes = [8, 32], strides = [1, 1]} : vector<16x32xf32> to vector<8x32xf32>
    %84 = vector.extract_strided_slice %9 {offsets = [8, 0], sizes = [8, 32], strides = [1, 1]} : vector<16x32xf32> to vector<8x32xf32>
    %85 = vector.extract_strided_slice %82 {offsets = [0, 0], sizes = [8, 8], strides = [1, 1]} : vector<8x32xf32> to vector<8x8xf32>
    %86 = vector.extract_strided_slice %83 {offsets = [0, 0], sizes = [8, 8], strides = [1, 1]} : vector<8x32xf32> to vector<8x8xf32>
    %87 = vector.extract_strided_slice %84 {offsets = [0, 0], sizes = [8, 8], strides = [1, 1]} : vector<8x32xf32> to vector<8x8xf32>
    %cst_30 = arith.constant dense<0.000000e+00> : vector<8x8xf32>
    %88 = tpu.matmul %85, %86, %cst_30 {dimension_numbers = #tpu.dot_dimension_numbers<[1], [1], [0], [0], [0, 0, 1, 0], [], []>} : vector<8x8xf32>, vector<8x8xf32>, vector<8x8xf32> -> vector<8x8xf32>
    %cst_31 = arith.constant 0.353553385 : f32
    %89 = vector.broadcast %cst_31 : f32 to vector<8x8xf32>
    %90 = arith.mulf %89, %88 : vector<8x8xf32>
    %cst_32 = arith.constant dense<0xFF800000> : vector<8xf32>
    %91 = vector.multi_reduction <maximumf>, %90, %cst_32 [1] : vector<8x8xf32> to vector<8xf32>
    %92 = vector.shape_cast %91 : vector<8xf32> to vector<8x1xf32>
    %93 = vector.broadcast %92 : vector<8x1xf32> to vector<8x8xf32>
    %94 = arith.subf %90, %93 : vector<8x8xf32>
    %95 = math.exp %94 : vector<8x8xf32>
    %cst_33 = arith.constant dense<0.000000e+00> : vector<8xf32>
    %96 = vector.multi_reduction <add>, %95, %cst_33 [1] : vector<8x8xf32> to vector<8xf32>
    %97 = vector.shape_cast %96 : vector<8xf32> to vector<8x1xf32>
    %98 = tpu.reciprocal %97 {approx = true} : vector<8x1xf32> -> vector<8x1xf32>
    %99 = vector.broadcast %98 : vector<8x1xf32> to vector<8x8xf32>
    %100 = arith.mulf %95, %99 : vector<8x8xf32>
    %cst_34 = arith.constant dense<0.000000e+00> : vector<8x8xf32>
    %101 = tpu.matmul %100, %87, %cst_34 {dimension_numbers = #tpu.dot_dimension_numbers<[1], [0], [0], [1], [0, 0, 1, 1], [], []>} : vector<8x8xf32>, vector<8x8xf32>, vector<8x8xf32> -> vector<8x8xf32>
    %102 = vector.extract_strided_slice %82 {offsets = [0, 8], sizes = [8, 8], strides = [1, 1]} : vector<8x32xf32> to vector<8x8xf32>
    %103 = vector.extract_strided_slice %83 {offsets = [0, 8], sizes = [8, 8], strides = [1, 1]} : vector<8x32xf32> to vector<8x8xf32>
    %104 = vector.extract_strided_slice %84 {offsets = [0, 8], sizes = [8, 8], strides = [1, 1]} : vector<8x32xf32> to vector<8x8xf32>
    %cst_35 = arith.constant dense<0.000000e+00> : vector<8x8xf32>
    %105 = tpu.matmul %102, %103, %cst_35 {dimension_numbers = #tpu.dot_dimension_numbers<[1], [1], [0], [0], [0, 0, 1, 0], [], []>} : vector<8x8xf32>, vector<8x8xf32>, vector<8x8xf32> -> vector<8x8xf32>
    %cst_36 = arith.constant 0.353553385 : f32
    %106 = vector.broadcast %cst_36 : f32 to vector<8x8xf32>
    %107 = arith.mulf %106, %105 : vector<8x8xf32>
    %cst_37 = arith.constant dense<0xFF800000> : vector<8xf32>
    %108 = vector.multi_reduction <maximumf>, %107, %cst_37 [1] : vector<8x8xf32> to vector<8xf32>
    %109 = vector.shape_cast %108 : vector<8xf32> to vector<8x1xf32>
    %110 = vector.broadcast %109 : vector<8x1xf32> to vector<8x8xf32>
    %111 = arith.subf %107, %110 : vector<8x8xf32>
    %112 = math.exp %111 : vector<8x8xf32>
    %cst_38 = arith.constant dense<0.000000e+00> : vector<8xf32>
    %113 = vector.multi_reduction <add>, %112, %cst_38 [1] : vector<8x8xf32> to vector<8xf32>
    %114 = vector.shape_cast %113 : vector<8xf32> to vector<8x1xf32>
    %115 = tpu.reciprocal %114 {approx = true} : vector<8x1xf32> -> vector<8x1xf32>
    %116 = vector.broadcast %115 : vector<8x1xf32> to vector<8x8xf32>
    %117 = arith.mulf %112, %116 : vector<8x8xf32>
    %cst_39 = arith.constant dense<0.000000e+00> : vector<8x8xf32>
    %118 = tpu.matmul %117, %104, %cst_39 {dimension_numbers = #tpu.dot_dimension_numbers<[1], [0], [0], [1], [0, 0, 1, 1], [], []>} : vector<8x8xf32>, vector<8x8xf32>, vector<8x8xf32> -> vector<8x8xf32>
    %119 = vector.extract_strided_slice %82 {offsets = [0, 16], sizes = [8, 8], strides = [1, 1]} : vector<8x32xf32> to vector<8x8xf32>
    %120 = vector.extract_strided_slice %83 {offsets = [0, 16], sizes = [8, 8], strides = [1, 1]} : vector<8x32xf32> to vector<8x8xf32>
    %121 = vector.extract_strided_slice %84 {offsets = [0, 16], sizes = [8, 8], strides = [1, 1]} : vector<8x32xf32> to vector<8x8xf32>
    %cst_40 = arith.constant dense<0.000000e+00> : vector<8x8xf32>
    %122 = tpu.matmul %119, %120, %cst_40 {dimension_numbers = #tpu.dot_dimension_numbers<[1], [1], [0], [0], [0, 0, 1, 0], [], []>} : vector<8x8xf32>, vector<8x8xf32>, vector<8x8xf32> -> vector<8x8xf32>
    %cst_41 = arith.constant 0.353553385 : f32
    %123 = vector.broadcast %cst_41 : f32 to vector<8x8xf32>
    %124 = arith.mulf %123, %122 : vector<8x8xf32>
    %cst_42 = arith.constant dense<0xFF800000> : vector<8xf32>
    %125 = vector.multi_reduction <maximumf>, %124, %cst_42 [1] : vector<8x8xf32> to vector<8xf32>
    %126 = vector.shape_cast %125 : vector<8xf32> to vector<8x1xf32>
    %127 = vector.broadcast %126 : vector<8x1xf32> to vector<8x8xf32>
    %128 = arith.subf %124, %127 : vector<8x8xf32>
    %129 = math.exp %128 : vector<8x8xf32>
    %cst_43 = arith.constant dense<0.000000e+00> : vector<8xf32>
    %130 = vector.multi_reduction <add>, %129, %cst_43 [1] : vector<8x8xf32> to vector<8xf32>
    %131 = vector.shape_cast %130 : vector<8xf32> to vector<8x1xf32>
    %132 = tpu.reciprocal %131 {approx = true} : vector<8x1xf32> -> vector<8x1xf32>
    %133 = vector.broadcast %132 : vector<8x1xf32> to vector<8x8xf32>
    %134 = arith.mulf %129, %133 : vector<8x8xf32>
    %cst_44 = arith.constant dense<0.000000e+00> : vector<8x8xf32>
    %135 = tpu.matmul %134, %121, %cst_44 {dimension_numbers = #tpu.dot_dimension_numbers<[1], [0], [0], [1], [0, 0, 1, 1], [], []>} : vector<8x8xf32>, vector<8x8xf32>, vector<8x8xf32> -> vector<8x8xf32>
    %136 = vector.extract_strided_slice %82 {offsets = [0, 24], sizes = [8, 8], strides = [1, 1]} : vector<8x32xf32> to vector<8x8xf32>
    %137 = vector.extract_strided_slice %83 {offsets = [0, 24], sizes = [8, 8], strides = [1, 1]} : vector<8x32xf32> to vector<8x8xf32>
    %138 = vector.extract_strided_slice %84 {offsets = [0, 24], sizes = [8, 8], strides = [1, 1]} : vector<8x32xf32> to vector<8x8xf32>
    %cst_45 = arith.constant dense<0.000000e+00> : vector<8x8xf32>
    %139 = tpu.matmul %136, %137, %cst_45 {dimension_numbers = #tpu.dot_dimension_numbers<[1], [1], [0], [0], [0, 0, 1, 0], [], []>} : vector<8x8xf32>, vector<8x8xf32>, vector<8x8xf32> -> vector<8x8xf32>
    %cst_46 = arith.constant 0.353553385 : f32
    %140 = vector.broadcast %cst_46 : f32 to vector<8x8xf32>
    %141 = arith.mulf %140, %139 : vector<8x8xf32>
    %cst_47 = arith.constant dense<0xFF800000> : vector<8xf32>
    %142 = vector.multi_reduction <maximumf>, %141, %cst_47 [1] : vector<8x8xf32> to vector<8xf32>
    %143 = vector.shape_cast %142 : vector<8xf32> to vector<8x1xf32>
    %144 = vector.broadcast %143 : vector<8x1xf32> to vector<8x8xf32>
    %145 = arith.subf %141, %144 : vector<8x8xf32>
    %146 = math.exp %145 : vector<8x8xf32>
    %cst_48 = arith.constant dense<0.000000e+00> : vector<8xf32>
    %147 = vector.multi_reduction <add>, %146, %cst_48 [1] : vector<8x8xf32> to vector<8xf32>
    %148 = vector.shape_cast %147 : vector<8xf32> to vector<8x1xf32>
    %149 = tpu.reciprocal %148 {approx = true} : vector<8x1xf32> -> vector<8x1xf32>
    %150 = vector.broadcast %149 : vector<8x1xf32> to vector<8x8xf32>
    %151 = arith.mulf %146, %150 : vector<8x8xf32>
    %cst_49 = arith.constant dense<0.000000e+00> : vector<8x8xf32>
    %152 = tpu.matmul %151, %138, %cst_49 {dimension_numbers = #tpu.dot_dimension_numbers<[1], [0], [0], [1], [0, 0, 1, 1], [], []>} : vector<8x8xf32>, vector<8x8xf32>, vector<8x8xf32> -> vector<8x8xf32>
    %153 = tpu.concatenate %101, %118, %135, %152 in 1 : vector<8x8xf32>, vector<8x8xf32>, vector<8x8xf32>, vector<8x8xf32> -> vector<8x32xf32>
    %154 = tpu.concatenate %81, %153 in 0 : vector<8x32xf32>, vector<8x32xf32> -> vector<16x32xf32>
    %c0_50 = arith.constant 0 : index
    %c0_51 = arith.constant 0 : index
    %155 = vector.load %arg5[%c0_50, %c0_51] : memref<32x32xf32, #tpu.memory_space<vmem>>, vector<32x32xf32>
    %cst_52 = arith.constant dense<0.000000e+00> : vector<16x32xf32>
    %156 = tpu.matmul %154, %155, %cst_52 {dimension_numbers = #tpu.dot_dimension_numbers<[1], [0], [0], [1], [0, 0, 1, 1], [], []>} : vector<16x32xf32>, vector<32x32xf32>, vector<16x32xf32> -> vector<16x32xf32>
    %157 = vector.shape_cast %156 : vector<16x32xf32> to vector<2x8x32xf32>
    %c0_53 = arith.constant 0 : index
    %c0_54 = arith.constant 0 : index
    %c0_55 = arith.constant 0 : index
    %158 = vector.load %arg6[%c0_53, %c0_54, %c0_55] : memref<2x8x32xf32, #tpu.memory_space<vmem>>, vector<2x8x32xf32>
    tpu.vector_store %arg6[%c0_53, %c0_54, %c0_55], %157 {strides = array<i32>} : memref<2x8x32xf32, #tpu.memory_space<vmem>>, vector<2x8x32xf32>,
    return
  }
  func.func @transform_0(%arg0: i32) -> (i32, i32, i32) {
    %c0_i32 = arith.constant 0 : i32
    %c0_i32_0 = arith.constant 0 : i32
    %c0_i32_1 = arith.constant 0 : i32
    return %arg0, %c0_i32, %c0_i32_0 : i32, i32, i32
  }
  func.func @transform_1(%arg0: i32) -> (i32, i32, i32) {
    %c0_i32 = arith.constant 0 : i32
    %c0_i32_0 = arith.constant 0 : i32
    %c0_i32_1 = arith.constant 0 : i32
    return %arg0, %c0_i32, %c0_i32_0 : i32, i32, i32
  }
  func.func @transform_2(%arg0: i32) -> (i32, i32) {
    %c0_i32 = arith.constant 0 : i32
    %c0_i32_0 = arith.constant 0 : i32
    %c0_i32_1 = arith.constant 0 : i32
    return %c0_i32, %c0_i32_0 : i32, i32
  }
  func.func @transform_3(%arg0: i32) -> (i32, i32) {
    %c0_i32 = arith.constant 0 : i32
    %c0_i32_0 = arith.constant 0 : i32
    %c0_i32_1 = arith.constant 0 : i32
    return %c0_i32, %c0_i32_0 : i32, i32
  }
  func.func @transform_4(%arg0: i32) -> (i32, i32) {
    %c0_i32 = arith.constant 0 : i32
    %c0_i32_0 = arith.constant 0 : i32
    %c0_i32_1 = arith.constant 0 : i32
    return %c0_i32, %c0_i32_0 : i32, i32
  }
  func.func @transform_5(%arg0: i32) -> (i32, i32, i32) {
    %c0_i32 = arith.constant 0 : i32
    %c0_i32_0 = arith.constant 0 : i32
    %c0_i32_1 = arith.constant 0 : i32
    return %arg0, %c0_i32, %c0_i32_0 : i32, i32, i32
  }
}

</mosaic_0001>

<bundles_post_ra>
// kernel: tpu_custom_call.1
= control target key start
LH: loop header
LB: loop body
LE: loop exit
PB: predicated region body
PF: predicated region fallthrough
CT: control target
= control target key end

     0   :  { %10 = vsyncpa [#allocation3], 0  ;;  %s1181_s0 = inlined_call_operand.hbm [shape: f32[2,8,32], index: 0, kind: input, shape index: {}]   ;;  %s1182_s1 = inlined_call_operand.hbm [shape: f32[2,8,32], index: 1, kind: input, shape index: {}]   ;;  %s1183_s2 = inlined_call_operand.hbm [shape: f32[32,32], index: 2, kind: input, shape index: {}]   ;;  %s1184_s3 = inlined_call_operand.hbm [shape: f32[32,64], index: 3, kind: input, shape index: {}]   ;;  %s1185_s4 = inlined_call_operand.hbm [shape: f32[32,32], index: 4, kind: input, shape index: {}]   ;;  %s1186_s5 = inlined_call_operand.hbm [shape: f32[2,8,32], index: 5, kind: output, shape index: {}]  }
   0x1   :  { %11 = vsyncpa [#allocation6], 0 }
   0x2   :  { %12 = vsyncpa [#allocation9], 0 }
   0x3   :  { %13 = vsyncpa [#allocation4], 0  ;;  %s31_s20 = sshll.u32 %s1182_s1, 4  ;;  %s1014_s21 = smov [#allocation5]   ;;  %s32_s20 = int_to_ptr.hbm [resolvable:$true] %s31_s20 }
   0x4   :  { %s33_s22 = sshll.u32 %s1014_s21, 4  ;;  %s57_s25 = sshll.u32 %s1184_s3, 4  ;;  %s34_s22 = int_to_ptr.vmem [resolvable:$true] %s33_s22  ;;  %s58_s25 = int_to_ptr.hbm [resolvable:$true] %s57_s25 }
   0x5   :  { %s1015_s26 = smov 128   ;;  %s1016_s27 = smov 8  }
   0x6   :  { %39 = dma.hbm_to_vmem [thread:$0]  %s32_s20, 256, %s34_s22, [#allocation6], %s1015_s26, %s1015_s26, %s1016_s27  }
   0x7   :  { %s1017_s28 = smov [#allocation8]   ;;  %s18_s1 = sshll.u32 %s1181_s0, 4  ;;  %s19_s1 = int_to_ptr.hbm [resolvable:$true] %s18_s1 }
   0x8   :  { %s59_s29 = sshll.u32 %s1017_s28, 4  ;;  %s44_s8 = sshll.u32 %s1183_s2, 4  ;;  %s60_s29 = int_to_ptr.vmem [resolvable:$true] %s59_s29  ;;  %s45_s8 = int_to_ptr.hbm [resolvable:$true] %s44_s8 }
   0x9   :  { %65 = dma.hbm_to_vmem [thread:$0]  %s58_s25, 512, %s60_s29, [#allocation9], %s1015_s26, %s1015_s26, %s1016_s27  }
   0xa   :  { %s1018_s9 = smov [#allocation2]   ;;  %s1019_s11 = smov [#allocation7]  }
   0xb   :  { %s20_s10 = sshll.u32 %s1018_s9, 4  ;;  %s46_s0 = sshll.u32 %s1019_s11, 4  ;;  %s21_s10 = int_to_ptr.vmem [resolvable:$true] %s20_s10  ;;  %s47_s0 = int_to_ptr.vmem [resolvable:$true] %s46_s0 }
   0xc   :  { %26 = dma.hbm_to_vmem [thread:$0]  %s19_s1, 256, %s21_s10, [#allocation3], %s1015_s26, %s1015_s26, %s1016_s27  }
   0xd   :  { %s70_s14 = sshll.u32 %s1185_s4, 4  ;;  %s1020_s2 = smov [#allocation10]   ;;  %s71_s14 = int_to_ptr.hbm [resolvable:$true] %s70_s14 }
   0xe   :  { %52 = dma.hbm_to_vmem [thread:$0]  %s45_s8, 512, %s47_s0, [#allocation6], %s1015_s26, %s1015_s26, %s1016_s27  }
   0xf   :  { %s72_s15 = sshll.u32 %s1020_s2, 4  ;;  %s73_s15 = int_to_ptr.vmem [resolvable:$true] %s72_s15 }
  0x10   :  { %78 = dma.hbm_to_vmem [thread:$0]  %s71_s14, 512, %s73_s15, [#allocation9], %s1015_s26, %s1015_s26, %s1016_s27  }
  0x11   :  { %1006 = dma.done.wait [#allocation3], 256  }
  0x12   :  { %1007 = vsyncadd [#allocation3], 4294967040 }
  0x13   :  { %1008 = dma.done.wait [#allocation6], 768  }
  0x14   :  { %1009 = vsyncadd [#allocation6], 4294966528 }
  0x15   :  { %1010 = dma.done.wait [#allocation9], 1024  }
  0x16   :  { %1011 = vsyncadd [#allocation9], 4294966272  ;;  %v140_v0 = vld [vmem:[#allocation8 + $0x18] sm:$0xff]  ;;  %v139_v1 = vld [vmem:[#allocation8 + $0x10] sm:$0xff]  ;;  %vm107_vm0 = vcmask 261120   ;;  %vm170_vm1 = vcmask 64512  }
  0x17   :  { %v106_v2 = vld [vmem:[#allocation7 + $0x18] sm:$0xff]  ;;  %159 = vmatpush.msra.mxu1 %v140_v0  ;;  %v105_v3 = vld [vmem:[#allocation7 + $0x10] sm:$0xff]  ;;  %v138_v4 = vld [vmem:[#allocation8 + $0x8] sm:$0xff]  ;;  %s1021_s4 = smov 104   ;;  %s1022_s16 = smov 112   ;;  %vm446_vm2 = vcmask 130048  }
  0x18   :  { %126 = vmatpush.msra.mxu0 %v106_v2  ;;  %v104_v5 = vld [vmem:[#allocation7 + $0x8] sm:$0xff]  ;;  %v137_v6 = vld [vmem:[#allocation8] sm:$0xff]  ;;  %v101_v8 = vld [vmem:[#allocation5] sm:$0xff]  ;;  %s1023_s17 = smov 120   ;;  %s1024_s18 = smov 96   ;;  %vm448_vm3 = vcmask 195584  }
  0x19   :  { %160 = vmatpush.msra.mxu1 %v139_v1  ;;  %v103_v7 = vld [vmem:[#allocation7] sm:$0xff]  ;;  %v100_v10 = vld [vmem:[#allocation2 + $0x8] sm:$0xff]  ;;  %v102_v11 = vld [vmem:[#allocation5 + $0x8] sm:$0xff]  ;;  %s1025_s19 = smov 80   ;;  %s1026_s20 = smov 88  }
  0x1a   :  { %127 = vmatpush.msra.mxu0 %v105_v3  ;;  %v99_v9 = vld [vmem:[#allocation2] sm:$0xff]  ;;  %s1027_s21 = smov 72   ;;  %s1028_s22 = smov 24  }
  0x1b   :  { %161 = vmatpush.msra.mxu1 %v138_v4  ;;  %s1029_s23 = smov 16   ;;  %s1030_s24 = smov [#allocation11]  }
  0x1c   :  { %128 = vmatpush.msra.mxu0 %v104_v5  ;;  %s766_s25 = sshll.u32 %s1030_s24, 4  ;;  %s768_s30 = sshll.u32 %s1186_s5, 4  ;;  %s767_s25 = int_to_ptr.vmem [resolvable:$true] %s766_s25  ;;  %s769_s30 = int_to_ptr.hbm [resolvable:$true] %s768_s30 }
  0x1d   :  { %162 = vmatpush.msra.mxu1 %v137_v6 }
  0x1e   :  { %129 = vmatpush.msra.mxu0 %v103_v7  ;;  %785 = vmatmul.msk.f32.vlgmr.msra.gmra.mxu1 %vm107_vm0, %v101_v8 }
  0x1f   :  { %783 = vmatmul.msk.f32.vlgmr.msra.gmra.mxu0 %vm107_vm0, %v99_v9 }
  0x26   :  { %786 = vmatmul.msk.f32.gmra.mxu1 %vm107_vm0, %v102_v11 }
  0x27   :  { %784 = vmatmul.msk.f32.gmra.mxu0 %vm107_vm0, %v100_v10 }
  0x9b   :  { %v1095_v12 = vpop.f32.mrf.mxu1 }
  0x9c   :  { %369 = vrot.lane.b32.xlu2 %v1095_v12, %s1021_s4  ;;  %303 = vrot.lane.b32.xlu1 %v1095_v12, %s1022_s16  ;;  %v131_v13 = vpop.f32.mrf.mxu0 }
  0x9d   :  { %237 = vrot.lane.b32.xlu0 %v1095_v12, %s1023_s17  ;;  %787 = vmatpush.xpose.msk.msra.mxu2 %vm170_vm1, %v1095_v12 }
  0xa0   :  { %788 = vmatmul.msk.f32.vlgmr.msra.gmra.mxu2 %vm170_vm1, %v131_v13 }
  0xa3   :  { %v1103_v15 = vpop.f32.mrf.mxu1 }
  0xa4   :  { %367 = vrot.lane.b32.xlu2 %v131_v13, %s1021_s4  ;;  %301 = vrot.lane.b32.xlu1 %v131_v13, %s1022_s16  ;;  %v134_v14 = vpop.f32.mrf.mxu0 }
  0xa5   :  { %235 = vrot.lane.b32.xlu0 %v131_v13, %s1023_s17 }
  0xac   :  { %516 = vrot.lane.b32.xlu2 %v1103_v15, %s1023_s17  ;;  %580 = vrot.lane.b32.xlu1 %v134_v14, %s1022_s16 }
  0xad   :  { %582 = vrot.lane.b32.xlu0 %v1103_v15, %s1022_s16 }
  0xb4   :  { %646 = vrot.lane.b32.xlu2 %v134_v14, %s1021_s4  ;;  %648 = vrot.lane.b32.xlu1 %v1103_v15, %s1021_s4 }
  0xb5   :  { %514 = vrot.lane.b32.xlu0 %v134_v14, %s1023_s17 }
  0xf6   :  { %v370_v16 = vpop.permute.xlu2 %369 }
  0xf7   :  { %796 = vmatpush.xpose.msk.msrb.mxu0 %vm170_vm1, %v370_v16 }
  0xfe   :  { %v368_v17 = vpop.permute.xlu2 %367 }
  0xff   :  { %797 = vmatmul.msk.f32.vlgmr.msrb.gmra.mxu0 %vm170_vm1, %v368_v17 }
 0x106   :  { %v517_v18 = vpop.permute.xlu2 %516 }
 0x107   :  { %802 = vmatpush.xpose.msk.msra.mxu0 %vm170_vm1, %v517_v18 }
 0x10e   :  { %v304_v19 = vpop.permute.xlu1 %303  ;;  %v647_v30 = vpop.permute.xlu2 %646 }
 0x10f   :  { %v238_v20 = vpop.permute.xlu0 %237 }
 0x110   :  { %790 = vmatpush.xpose.msk.msra.mxu3 %vm170_vm1, %v238_v20 }
 0x114   :  { %793 = vmatpush.xpose.msk.msrb.mxu3 %vm170_vm1, %v304_v19 }
 0x116   :  { %v302_v21 = vpop.permute.xlu1 %301 }
 0x117   :  { %v236_v22 = vpop.permute.xlu0 %235 }
 0x118   :  { %791 = vmatmul.msk.f32.vlgmr.msra.gmra.mxu3 %vm170_vm1, %v236_v22 }
 0x119   :  { %799 = vmatpush.xpose.msk.msra.mxu3 %vm170_vm1, %v1103_v15 }
 0x11e   :  { %v581_v23 = vpop.permute.xlu1 %580 }
 0x11f   :  { %v583_v24 = vpop.permute.xlu0 %582 }
 0x120   :  { %794 = vmatmul.msk.f32.vlgmr.msrb.gmra.mxu3 %vm170_vm1, %v302_v21 }
 0x121   :  { %805 = vmatpush.xpose.msk.msrb.mxu3 %vm170_vm1, %v583_v24 }
 0x123   :  { %v194_v25 = vpop.f32.mrf.mxu2 }
 0x124   :  { %v197_v26 = vmul.f32 0.35355338, %v194_v25 }
 0x126   :  { %v198_v27 = vsel %vm170_vm1, %v197_v26, -inf  ;;  %v649_v28 = vpop.permute.xlu1 %648 }
 0x127   :  { %199 = vmax.xlane.f32.xlu0 %v198_v27  ;;  %v515_v29 = vpop.permute.xlu0 %514  ;;  %808 = vmatpush.xpose.msk.msrb.mxu0 %vm170_vm1, %v649_v28 }
 0x128   :  { %800 = vmatmul.msk.f32.vlgmr.msra.gmra.mxu3 %vm170_vm1, %v134_v14  ;;  %803 = vmatmul.msk.f32.vlgmr.msra.gmra.mxu0 %vm170_vm1, %v515_v29 }
 0x130   :  { %806 = vmatmul.msk.f32.vlgmr.msrb.gmra.mxu3 %vm170_vm1, %v581_v23  ;;  %809 = vmatmul.msk.f32.vlgmr.msrb.gmra.mxu0 %vm170_vm1, %v647_v30 }
 0x13b   :  { %209 = vrot.lane.b32.xlu0 %v1095_v12, %s1024_s18 }
 0x17c   :  { %v392_v31 = vpop.f32.mrf.mxu0 }
 0x17d   :  { %v395_v32 = vmul.f32 0.35355338, %v392_v31 }
 0x17f   :  { %v396_v33 = vsel %vm170_vm1, %v395_v32, -inf }
 0x180   :  { %397 = vmax.xlane.f32.xlu2 %v396_v33 }
 0x19a   :  { %v200_v35 = vpop.xlane.xlu0 %199 }
 0x19b   :  { %v260_v34 = vpop.f32.mrf.mxu3  ;;  %v201_v38 = vsub.f32 %v197_v26, %v200_v35 }
 0x19c   :  { %v263_v36 = vmul.f32 0.35355338, %v260_v34 }
 0x19d   :  { %v202_v39 = vmul.f32 1.442695, %v201_v38 }
 0x19e   :  { %v264_v37 = vsel %vm170_vm1, %v263_v36, -inf }
 0x19f   :  { %265 = vmax.xlane.f32.xlu1 %v264_v37  ;;  %830 = vpow2.f32 %v202_v39 }
 0x1a3   :  { %v326_v40 = vpop.f32.mrf.mxu3 }
 0x1a4   :  { %v329_v41 = vmul.f32 0.35355338, %v326_v40 }
 0x1a5   :  { %v539_v42 = vpop.f32.mrf.mxu0  ;;  %v831_v47 = vpop.eup %830 }
 0x1a6   :  { %v542_v43 = vmul.f32 0.35355338, %v539_v42  ;;  %v330_v44 = vsel %vm170_vm1, %v329_v41, -inf  ;;  %v204_v52 = vsel %vm170_vm1, %v831_v47, 0.0 }
 0x1a7   :  { %331 = vmax.xlane.f32.xlu2 %v330_v44 }
 0x1a8   :  { %v543_v45 = vsel %vm170_vm1, %v542_v43, -inf }
 0x1a9   :  { %544 = vmax.xlane.f32.xlu1 %v543_v45 }
 0x1ab   :  { %v473_v46 = vpop.f32.mrf.mxu3 }
 0x1ac   :  { %v1132_v54 = vmul.f32 0.35355338, %v473_v46 }
 0x1ad   :  { %v210_v48 = vpop.permute.xlu0 %209  ;;  %v671_v49 = vpop.f32.mrf.mxu0 }
 0x1ae   :  { %v674_v50 = vmul.f32 0.35355338, %v671_v49  ;;  %230 = vmatpush.msrb.mxu2 %v210_v48  ;;  %v477_v57 = vsel %vm170_vm1, %v1132_v54, -inf }
 0x1b0   :  { %v675_v51 = vsel %vm170_vm1, %v674_v50, -inf }
 0x1b1   :  { %676 = vmax.xlane.f32.xlu0 %v675_v51  ;;  %205 = vadd.xlane.f32.xlu1 %v204_v52 }
 0x1b3   :  { %v605_v53 = vpop.f32.mrf.mxu3 }
 0x1b4   :  { %v608_v55 = vmul.f32 0.35355338, %v605_v53 }
 0x1b6   :  { %v609_v56 = vsel %vm170_vm1, %v608_v55, -inf }
 0x1b7   :  { %610 = vmax.xlane.f32.xlu2 %v609_v56 }
 0x1b9   :  { %478 = vmax.xlane.f32.xlu0 %v477_v57 }
 0x1ca   :  { %488 = vrot.lane.b32.xlu1 %v1103_v15, %s1024_s18 }
 0x1cd   :  { %341 = vrot.lane.b32.xlu0 %v1095_v12, %s1025_s19 }
 0x1cf   :  { %275 = vrot.lane.b32.xlu2 %v1095_v12, %s1026_s20 }
 0x1d5   :  { %407 = vrot.lane.b32.xlu0 %v1095_v12, %s1027_s21 }
 0x1f3   :  { %v398_v58 = vpop.xlane.xlu2 %397 }
 0x1f4   :  { %v399_v59 = vsub.f32 %v395_v32, %v398_v58 }
 0x1f6   :  { %v400_v60 = vmul.f32 1.442695, %v399_v59 }
 0x1f8   :  { %832 = vpow2.f32 %v400_v60 }
 0x1fe   :  { %v833_v61 = vpop.eup %832 }
 0x1ff   :  { %v402_v62 = vsel %vm170_vm1, %v833_v61, 0.0 }
 0x200   :  { %403 = vadd.xlane.f32.xlu1 %v402_v62 }
 0x212   :  { %v266_v63 = vpop.xlane.xlu1 %265 }
 0x213   :  { %v267_v0 = vsub.f32 %v263_v36, %v266_v63 }
 0x215   :  { %v268_v1 = vmul.f32 1.442695, %v267_v0 }
 0x217   :  { %834 = vpow2.f32 %v268_v1 }
 0x21a   :  { %v332_v2 = vpop.xlane.xlu2 %331 }
 0x21b   :  { %v333_v7 = vsub.f32 %v329_v41, %v332_v2  ;;  %v730_v2 = vld [vmem:[#allocation10 + $0x18] sm:$0xff] }
 0x21c   :  { %v545_v3 = vpop.xlane.xlu1 %544  ;;  %749 = vmatpush.msra.mxu3 %v730_v2 }
 0x21d   :  { %v835_v4 = vpop.eup %834  ;;  %v546_v5 = vsub.f32 %v542_v43, %v545_v3  ;;  %v334_v9 = vmul.f32 1.442695, %v333_v7  ;;  %v729_v3 = vld [vmem:[#allocation10 + $0x10] sm:$0xff]  ;;  %v727_v7 = vld [vmem:[#allocation10] sm:$0xff] }
 0x21e   :  { %v270_v6 = vsel %vm170_vm1, %v835_v4, 0.0  ;;  %750 = vmatpush.msra.mxu3 %v729_v3 }
 0x21f   :  { %v547_v8 = vmul.f32 1.442695, %v546_v5  ;;  %271 = vadd.xlane.f32.xlu2 %v270_v6  ;;  %v728_v5 = vld [vmem:[#allocation10 + $0x8] sm:$0xff] }
 0x220   :  { %751 = vmatpush.msra.mxu3 %v728_v5 }
 0x221   :  { %836 = vpow2.f32 %v547_v8 }
 0x222   :  { %752 = vmatpush.msra.mxu3 %v727_v7 }
 0x224   :  { %v677_v10 = vpop.xlane.xlu0 %676  ;;  %v206_v11 = vpop.xlane.xlu1 %205 }
 0x225   :  { %v678_v12 = vsub.f32 %v674_v50, %v677_v10  ;;  %838 = vrcp.f32 %v206_v11 }
 0x226   :  { %840 = vpow2.f32 %v334_v9 }
 0x227   :  { %v837_v13 = vpop.eup %836  ;;  %v679_v14 = vmul.f32 1.442695, %v678_v12 }
 0x228   :  { %v549_v16 = vsel %vm170_vm1, %v837_v13, 0.0 }
 0x229   :  { %842 = vpow2.f32 %v679_v14  ;;  %550 = vadd.xlane.f32.xlu1 %v549_v16 }
 0x22a   :  { %v611_v17 = vpop.xlane.xlu2 %610 }
 0x22b   :  { %v839_v18 = vpop.eup %838  ;;  %v612_v19 = vsub.f32 %v608_v55, %v611_v17 }
 0x22c   :  { %v208_v20 = vmul.f32 %v839_v18, %v831_v47  ;;  %v841_v21 = vpop.eup %840  ;;  %v479_v29 = vpop.xlane.xlu0 %478 }
 0x22d   :  { %v613_v22 = vmul.f32 1.442695, %v612_v19  ;;  %v336_v25 = vsel %vm170_vm1, %v841_v21, 0.0  ;;  %v480_v32 = vsub.f32 %v1132_v54, %v479_v29 }
 0x22e   :  { %789 = vmatmul.msk.f32.vlgmr.msrb.gmra.mxu2 %vm170_vm1, %v208_v20 }
 0x22f   :  { %v843_v23 = vpop.eup %842  ;;  %844 = vpow2.f32 %v613_v22  ;;  %v481_v33 = vmul.f32 1.442695, %v480_v32 }
 0x230   :  { %v681_v24 = vsel %vm170_vm1, %v843_v23, 0.0 }
 0x231   :  { %682 = vadd.xlane.f32.xlu0 %v681_v24  ;;  %337 = vadd.xlane.f32.xlu1 %v336_v25  ;;  %846 = vpow2.f32 %v481_v33 }
 0x232   :  { %v276_v26 = vpop.permute.xlu2 %275 }
 0x233   :  { %296 = vmatpush.msra.mxu2 %v276_v26 }
 0x235   :  { %v845_v27 = vpop.eup %844 }
 0x236   :  { %v615_v28 = vsel %vm170_vm1, %v845_v27, 0.0 }
 0x237   :  { %616 = vadd.xlane.f32.xlu2 %v615_v28  ;;  %v847_v35 = vpop.eup %846 }
 0x238   :  { %v483_v37 = vsel %vm170_vm1, %v847_v35, 0.0 }
 0x23c   :  { %v489_v34 = vpop.permute.xlu1 %488 }
 0x23f   :  { %v342_v30 = vpop.permute.xlu0 %341 }
 0x240   :  { %362 = vmatpush.msrb.mxu2 %v342_v30 }
 0x247   :  { %v408_v31 = vpop.permute.xlu0 %407 }
 0x248   :  { %428 = vmatpush.msrb.mxu1 %v408_v31 }
 0x24a   :  { %554 = vrot.lane.b32.xlu1 %v1103_v15, %s1026_s20 }
 0x24f   :  { %686 = vrot.lane.b32.xlu2 %v1103_v15, %s1027_s21 }
 0x273   :  { %v404_v36 = vpop.xlane.xlu1 %403 }
 0x274   :  { %848 = vrcp.f32 %v404_v36  ;;  %484 = vadd.xlane.f32.xlu1 %v483_v37 }
 0x27a   :  { %v849_v38 = vpop.eup %848 }
 0x27b   :  { %v406_v39 = vmul.f32 %v849_v38, %v833_v61 }
 0x27d   :  { %798 = vmatmul.msk.f32.vlgmr.msrb.gmra.mxu1 %vm170_vm1, %v406_v39 }
 0x28d   :  { %620 = vrot.lane.b32.xlu1 %v1103_v15, %s1025_s19 }
 0x292   :  { %v272_v40 = vpop.xlane.xlu2 %271 }
 0x293   :  { %850 = vrcp.f32 %v272_v40 }
 0x299   :  { %v851_v41 = vpop.eup %850 }
 0x29a   :  { %v274_v42 = vmul.f32 %v851_v41, %v835_v4 }
 0x29c   :  { %v551_v43 = vpop.xlane.xlu1 %550  ;;  %792 = vmatmul.msk.f32.vlgmr.msra.gmra.mxu2 %vm170_vm1, %v274_v42 }
 0x29d   :  { %509 = vmatpush.msra.mxu2 %v489_v34 }
 0x2a4   :  { %v338_v44 = vpop.xlane.xlu1 %337  ;;  %v683_v48 = vpop.xlane.xlu0 %682 }
 0x2a5   :  { %852 = vrcp.f32 %v338_v44 }
 0x2a6   :  { %854 = vrcp.f32 %v551_v43 }
 0x2a7   :  { %856 = vrcp.f32 %v683_v48 }
 0x2aa   :  { %v617_v47 = vpop.xlane.xlu2 %616 }
 0x2ab   :  { %v853_v45 = vpop.eup %852 }
 0x2ac   :  { %v340_v46 = vmul.f32 %v853_v45, %v841_v21  ;;  %v855_v49 = vpop.eup %854 }
 0x2ad   :  { %v553_v15 = vmul.f32 %v855_v49, %v837_v13  ;;  %v857_v52 = vpop.eup %856 }
 0x2ae   :  { %795 = vmatmul.msk.f32.vlgmr.msrb.gmra.mxu2 %vm170_vm1, %v340_v46  ;;  %v685_v53 = vmul.f32 %v857_v52, %v843_v23 }
 0x2b1   :  { %v232_v60 = vpop.f32.mrf.mxu2 }
 0x2b2   :  { %v687_v51 = vpop.permute.xlu2 %686 }
 0x2bc   :  { %v555_v50 = vpop.permute.xlu1 %554 }
 0x2bd   :  { %575 = vmatpush.msra.mxu1 %v555_v50 }
 0x2be   :  { %804 = vmatmul.msk.f32.vlgmr.msra.gmra.mxu1 %vm170_vm1, %v553_v15 }
 0x2bf   :  { %707 = vmatpush.msrb.mxu1 %v687_v51 }
 0x2c6   :  { %810 = vmatmul.msk.f32.vlgmr.msrb.gmra.mxu1 %vm170_vm1, %v685_v53 }
 0x2e7   :  { %v485_v54 = vpop.xlane.xlu1 %484 }
 0x2e8   :  { %858 = vrcp.f32 %v485_v54 }
 0x2e9   :  { %860 = vrcp.f32 %v617_v47 }
 0x2ee   :  { %v859_v55 = vpop.eup %858 }
 0x2ef   :  { %v487_v56 = vmul.f32 %v859_v55, %v847_v35  ;;  %v861_v57 = vpop.eup %860 }
 0x2f0   :  { %v619_v58 = vmul.f32 %v861_v57, %v845_v27 }
 0x2f1   :  { %801 = vmatmul.msk.f32.vlgmr.msra.gmra.mxu2 %vm170_vm1, %v487_v56 }
 0x2fa   :  { %v430_v62 = vpop.f32.mrf.mxu1 }
 0x2ff   :  { %v621_v59 = vpop.permute.xlu1 %620 }
 0x300   :  { %641 = vmatpush.msrb.mxu2 %v621_v59 }
 0x301   :  { %807 = vmatmul.msk.f32.vlgmr.msrb.gmra.mxu2 %vm170_vm1, %v619_v58 }
 0x31f   :  { %v298_v61 = vpop.f32.mrf.mxu2 }
 0x320   :  { %434 = vrot.lane.b32.xlu1 %v298_v61, %s1016_s27 }
 0x328   :  { %442 = vrot.lane.b32.xlu1 %v430_v62, %s1028_s22 }
 0x331   :  { %v364_v63 = vpop.f32.mrf.mxu2 }
 0x332   :  { %438 = vrot.lane.b32.xlu0 %v364_v63, %s1029_s23 }
 0x33b   :  { %v577_v0 = vpop.f32.mrf.mxu1 }
 0x33c   :  { %713 = vrot.lane.b32.xlu1 %v577_v0, %s1016_s27 }
 0x343   :  { %v709_v1 = vpop.f32.mrf.mxu1 }
 0x344   :  { %721 = vrot.lane.b32.xlu1 %v709_v1, %s1028_s22 }
 0x374   :  { %v511_v4 = vpop.f32.mrf.mxu2 }
 0x384   :  { %v643_v6 = vpop.f32.mrf.mxu2 }
 0x385   :  { %717 = vrot.lane.b32.xlu2 %v643_v6, %s1029_s23 }
 0x392   :  { %v435_v8 = vpop.permute.xlu1 %434 }
 0x393   :  { %v445_v9 = vsel %vm170_vm1, %v232_v60, %v435_v8 }
 0x39a   :  { %v443_v11 = vpop.permute.xlu1 %442 }
 0x3a4   :  { %v439_v10 = vpop.permute.xlu0 %438 }
 0x3a5   :  { %v447_v12 = vsel %vm446_vm2, %v445_v9, %v439_v10 }
 0x3a6   :  { %v449_v13 = vsel %vm448_vm3, %v447_v12, %v443_v11 }
 0x3a7   :  { %811 = vmatmul.msk.f32.vlgmr.msra.gmra.mxu3 %vm107_vm0, %v449_v13 }
 0x3ae   :  { %v714_v14 = vpop.permute.xlu1 %713 }
 0x3af   :  { %v724_v16 = vsel %vm170_vm1, %v511_v4, %v714_v14 }
 0x3b6   :  { %v722_v18 = vpop.permute.xlu1 %721 }
 0x3df   :  { %v718_v17 = vpop.permute.xlu2 %717 }
 0x3e0   :  { %v725_v19 = vsel %vm446_vm2, %v724_v16, %v718_v17 }
 0x3e1   :  { %v726_v20 = vsel %vm448_vm3, %v725_v19, %v722_v18 }
 0x3e2   :  { %812 = vmatmul.msk.f32.gmra.mxu3 %vm107_vm0, %v726_v20 }
 0x42a   :  { %v754_v21 = vpop.f32.mrf.mxu3 }
 0x42b   :  { %760 = vst.msk [vmem:[#allocation11] sm:$0xff] %vm107_vm0, %v754_v21 }
 0x465   :  { %v757_v22 = vpop.f32.mrf.mxu3 }
 0x466   :  { %761 = vst.msk [vmem:[#allocation11 + $0x8] sm:$0xff] %vm107_vm0, %v757_v22 }
 0x467   :  { %774 = dma.vmem_to_hbm [thread:$0]  %s767_s25, 256, %s769_s30, [#allocation4], %s1015_s26, %s1015_s26, %s1016_s27  }
 0x468   :  { %1012 = dma.done.wait [#allocation4], 256  }
 0x469   :  { %1013 = vsyncadd [#allocation4], 4294967040 }
 0x46a   :  { %779 = vsyncpa [#allocation3], 1 }
 0x46b   :  { %780 = vsyncpa [#allocation6], 1 }
 0x46c   :  { %781 = vsyncpa [#allocation9], 1 }
 0x46d   :  { %782 = vsyncpa [#allocation4], 1 }

</bundles_post_ra>
